<compile_context>
chip_gen: v6e
topology: v6e:2x2x1
jax: 0.10.0
libtpu: 0.0.40
codegen_flags: <defaults>
</compile_context>

<pallas_src>
import functools

import jax
import jax.numpy as jnp
from jax.experimental import pallas as pl
from jax.experimental.pallas import tpu as pltpu


def discriminator_kernel(c1_ref, c2_ref, h1_ref, h2_ref, h3_ref, h4_ref,
                         w_ref, bias_ref, out_ref, *, use_mxu):
    # c1_ref, c2_ref: (BB, H)      graph summary vectors
    # h*_ref:         (BB, N, H)   node embeddings (any float dtype; upcast to f32)
    # w_ref:          (H, H)       W^T if use_mxu else W (W[i, j] = weight[0, i, j])
    # bias_ref:       (1,) f32     bilinear bias, in SMEM
    # out_ref:        (BB, 4, N)   four score groups, N on the lane axis
    c1 = c1_ref[...].astype(jnp.float32)                    # (BB, H)
    c2 = c2_ref[...].astype(jnp.float32)                    # (BB, H)
    w = w_ref[...]                                          # (H, H), f32
    bias = bias_ref[0]                                      # scalar from SMEM

    if use_mxu:
        # w holds W^T; v[b, i] = sum_j W[0, i, j] * c[b, j]  (MXU, f32 accumulate).
        v1 = jnp.dot(c1, w, preferred_element_type=jnp.float32,
                     precision=jax.lax.Precision.HIGHEST)
        v2 = jnp.dot(c2, w, preferred_element_type=jnp.float32,
                     precision=jax.lax.Precision.HIGHEST)
    else:
        # Small H: a padded systolic pass is pure latency — do the tiny transform
        # exactly in f32 on the VPU.  w holds W (untransposed), j on the lane axis.
        v1 = jnp.sum(c1[:, None, :] * w[None, :, :], axis=-1)   # (BB, H)
        v2 = jnp.sum(c2[:, None, :] * w[None, :, :], axis=-1)   # (BB, H)

    v1 = v1[:, None, :]                                     # (BB, 1, H)
    v2 = v2[:, None, :]

    def score(h_ref, v):
        # H on the lane axis: VPU broadcast-multiply + cheap lane reduce.
        return jnp.sum(h_ref[...].astype(jnp.float32) * v, axis=-1) + bias   # (BB, N)

    # Direct per-group slab stores — no in-kernel concatenation / lane relayout.
    out_ref[:, 0, :] = score(h2_ref, v1).astype(out_ref.dtype)
    out_ref[:, 1, :] = score(h1_ref, v2).astype(out_ref.dtype)
    out_ref[:, 2, :] = score(h4_ref, v1).astype(out_ref.dtype)
    out_ref[:, 3, :] = score(h3_ref, v2).astype(out_ref.dtype)


def _round_up(x, m):
    return ((x + m - 1) // m) * m


def discriminator_forward(c1, c2, h1, h2, h3, h4, weight, bias, *, block_b=None):
    """c1, c2: (B, H); h1..h4: (B, N, H); weight: (1, H, H); bias: (1,).

    Returns logits of shape (B, 4N) = concat([f(h2,c1), f(h1,c2), f(h4,c1), f(h3,c2)], 1).
    h tensors may be bf16 (halves HBM traffic); all arithmetic runs in f32.
    """
    B, N, H = h1.shape
    out_dtype = h1.dtype
    itemsize = jnp.dtype(h1.dtype).itemsize

    # Per-core VMEM capacity (v5e/v6e: 128 MiB, v7x: 64 MiB); conservative fallback.
    try:
        vmem_cap = int(pltpu.get_tpu_info().vmem_capacity_bytes)
    except Exception:
        vmem_cap = 64 * 1024 * 1024

    # ---- VMEM-budgeted batch block -------------------------------------------
    if block_b is None:
        # Double-buffered h tiles dominate VMEM: 2 bufs x 4 tensors x block_b*N*H.
        budget = int(vmem_cap * 0.4)                 # headroom for c/out/W + scratch
        bytes_per_batch_row = 2 * 4 * N * H * itemsize
        cap_b = max(8, (budget // max(bytes_per_batch_row, 1)) // 8 * 8)
        # Target >= 4 grid steps so both v7x TensorCores keep a pipelined stream.
        target_b = _round_up(max(1, pl.cdiv(B, 4)), 8)
        block_b = max(8, min(cap_b, target_b))

    if block_b >= B:
        block_b = B                                  # one step: block == full dim, no padding
    else:
        block_b = max(8, (block_b // 8) * 8)         # sublane-dense c tiles / unmasked stores

    # Pad B up instead of divisor-searching block_b down (keeps big, dense tiles).
    B_pad = _round_up(B, block_b)
    if B_pad != B:
        pad = B_pad - B
        c1 = jnp.pad(c1, ((0, pad), (0, 0)))
        c2 = jnp.pad(c2, ((0, pad), (0, 0)))
        pad3 = ((0, pad), (0, 0), (0, 0))
        h1, h2, h3, h4 = (jnp.pad(h, pad3) for h in (h1, h2, h3, h4))
    nb = B_pad // block_b

    # ---- weight orientation / compute path -----------------------------------
    use_mxu = H > 64                                 # tiny H: VPU beats a padded MXU pass
    w2d = weight.reshape(H, H).astype(jnp.float32)   # w2d[i, j] = W[0, i, j]
    w_arg = w2d.T if use_mxu else w2d                # MXU path consumes W^T (c @ W^T)
    bias_arg = bias.reshape(1).astype(jnp.float32)

    # ---- explicit scoped-VMEM limit matched to the chosen block ---------------
    per_step_bytes = (
        2 * 4 * block_b * N * H * itemsize           # h tiles (double-buffered)
        + 2 * 2 * block_b * H * itemsize             # c tiles
        + 2 * block_b * 4 * N * itemsize             # out tile
        + H * H * 4                                  # weight
    )
    vmem_limit = int(min(vmem_cap,
                         max(2 * per_step_bytes + (1 << 20), 32 * 1024 * 1024)))

    kernel = functools.partial(discriminator_kernel, use_mxu=use_mxu)
    out = pl.pallas_call(
        kernel,
        out_shape=jax.ShapeDtypeStruct((B_pad, 4, N), out_dtype),
        grid_spec=pltpu.PrefetchScalarGridSpec(
            num_scalar_prefetch=0,
            grid=(nb,),
            in_specs=[
                pl.BlockSpec((block_b, H), lambda b: (b, 0)),          # c1
                pl.BlockSpec((block_b, H), lambda b: (b, 0)),          # c2
                pl.BlockSpec((block_b, N, H), lambda b: (b, 0, 0)),    # h1
                pl.BlockSpec((block_b, N, H), lambda b: (b, 0, 0)),    # h2
                pl.BlockSpec((block_b, N, H), lambda b: (b, 0, 0)),    # h3
                pl.BlockSpec((block_b, N, H), lambda b: (b, 0, 0)),    # h4
                pl.BlockSpec((H, H), lambda b: (0, 0)),                # W or W^T
                pl.BlockSpec(memory_space=pltpu.MemorySpace.SMEM),     # bias scalar
            ],
            out_specs=pl.BlockSpec((block_b, 4, N), lambda b: (b, 0, 0)),
        ),
        compiler_params=pltpu.CompilerParams(
            dimension_semantics=("parallel",),
            vmem_limit_bytes=vmem_limit,
        ),
    )(c1, c2, h1, h2, h3, h4, w_arg, bias_arg)

    # TODO(synk): for very large N*H on v7x, add a second 'parallel' grid axis tiling N
    # (the (B, 4, N) output layout already supports contiguous per-N-tile writes).

    # (B_pad, 4, N) -> (B, 4N); row b is [sc1 | sc2 | sc3 | sc4] == torch.cat(dim=1).
    return out[:B].reshape(B, 4 * N)


def discriminator_reference(c1, c2, h1, h2, h3, h4, weight, bias):
    """Pure-JAX reference mirroring the PyTorch forward."""
    H = h1.shape[-1]
    W = weight.reshape(H, H)

    def bilin(x, c):  # x: (B, N, H), c: (B, H) -> (B, N)
        return jnp.einsum("bni,ij,bj->bn", x, W, c,
                          precision=jax.lax.Precision.HIGHEST) + bias[0]

    sc1 = bilin(h2, c1)
    sc2 = bilin(h1, c2)
    sc3 = bilin(h4, c1)
    sc4 = bilin(h3, c2)
    return jnp.concatenate([sc1, sc2, sc3, sc4], axis=1)


if __name__ == "__main__":
    key = jax.random.PRNGKey(0)
    B, N, H = 2, 8, 32   # batch, nodes per graph, n_h

    keys = jax.random.split(key, 7)
    c1 = jax.random.normal(keys[0], (B, H), dtype=jnp.float32)
    c2 = jax.random.normal(keys[1], (B, H), dtype=jnp.float32)
    h1 = jax.random.normal(keys[2], (B, N, H), dtype=jnp.float32)
    h2 = jax.random.normal(keys[3], (B, N, H), dtype=jnp.float32)
    h3 = jax.random.normal(keys[4], (B, N, H), dtype=jnp.float32)
    h4 = jax.random.normal(keys[5], (B, N, H), dtype=jnp.float32)
    # Bilinear params (xavier-uniform-style weight; exercise a nonzero bias path).
    weight = jax.random.uniform(keys[6], (1, H, H), dtype=jnp.float32,
                                minval=-0.2, maxval=0.2)
    bias = jnp.full((1,), 0.05, dtype=jnp.float32)

    logits = discriminator_forward(c1, c2, h1, h2, h3, h4, weight, bias)
    logits = jax.block_until_ready(logits)

    ref = discriminator_reference(c1, c2, h1, h2, h3, h4, weight, bias)
    assert logits.shape == (B, 4 * N), f"bad shape {logits.shape}"
    assert jnp.allclose(logits, ref, atol=1e-3, rtol=1e-3), "logits mismatch"

    print("KERNEL_OK")
</pallas_src>

<mosaic_0001>
module attributes {stable_mosaic.version = 11 : i64} {
  func.func @discriminator_kernel(%arg0: i32, %arg1: memref<2x32xf32, #tpu.memory_space<vmem>>, %arg2: memref<2x32xf32, #tpu.memory_space<vmem>>, %arg3: memref<2x8x32xf32, #tpu.memory_space<vmem>>, %arg4: memref<2x8x32xf32, #tpu.memory_space<vmem>>, %arg5: memref<2x8x32xf32, #tpu.memory_space<vmem>>, %arg6: memref<2x8x32xf32, #tpu.memory_space<vmem>>, %arg7: memref<32x32xf32, #tpu.memory_space<vmem>>, %arg8: memref<1xf32, #tpu.memory_space<smem>>, %arg9: memref<2x4x8xf32, #tpu.memory_space<vmem>>) attributes {dimension_semantics = [#tpu.dimension_semantics<parallel>], iteration_bounds = array<i64: 1>, scalar_prefetch = 0 : i64, scratch_operands = 0 : i64, tpu.core_type = #tpu.core_type<tc>, window_params = [{transform_indices = @transform_0, window_bounds = array<i64: 2, 32>}, {transform_indices = @transform_1, window_bounds = array<i64: 2, 32>}, {transform_indices = @transform_2, window_bounds = array<i64: 2, 8, 32>}, {transform_indices = @transform_3, window_bounds = array<i64: 2, 8, 32>}, {transform_indices = @transform_4, window_bounds = array<i64: 2, 8, 32>}, {transform_indices = @transform_5, window_bounds = array<i64: 2, 8, 32>}, {pipeline_mode = #tpu.pipeline_mode<synchronous>, transform_indices = @transform_6, window_bounds = array<i64: 32, 32>}, {transform_indices = @transform_7, window_bounds = array<i64: 1>}, {transform_indices = @transform_8, window_bounds = array<i64: 2, 4, 8>}]} {
    %c0 = arith.constant 0 : index
    %c0_0 = arith.constant 0 : index
    %0 = vector.load %arg1[%c0, %c0_0] : memref<2x32xf32, #tpu.memory_space<vmem>>, vector<2x32xf32>
    %c0_1 = arith.constant 0 : index
    %c0_2 = arith.constant 0 : index
    %1 = vector.load %arg2[%c0_1, %c0_2] : memref<2x32xf32, #tpu.memory_space<vmem>>, vector<2x32xf32>
    %c0_3 = arith.constant 0 : index
    %c0_4 = arith.constant 0 : index
    %2 = vector.load %arg7[%c0_3, %c0_4] : memref<32x32xf32, #tpu.memory_space<vmem>>, vector<32x32xf32>
    %c0_5 = arith.constant 0 : index
    %3 = memref.load %arg8[%c0_5] : memref<1xf32, #tpu.memory_space<smem>>
    %4 = vector.shape_cast %0 : vector<2x32xf32> to vector<2x1x32xf32>
    %5 = vector.shape_cast %2 : vector<32x32xf32> to vector<1x32x32xf32>
    %6 = vector.broadcast %4 : vector<2x1x32xf32> to vector<2x32x32xf32>
    %7 = vector.broadcast %5 : vector<1x32x32xf32> to vector<2x32x32xf32>
    %8 = arith.mulf %6, %7 : vector<2x32x32xf32>
    %cst = arith.constant dense<0.000000e+00> : vector<2x32xf32>
    %9 = vector.multi_reduction <add>, %8, %cst [2] : vector<2x32x32xf32> to vector<2x32xf32>
    %10 = vector.shape_cast %1 : vector<2x32xf32> to vector<2x1x32xf32>
    %11 = vector.shape_cast %2 : vector<32x32xf32> to vector<1x32x32xf32>
    %12 = vector.broadcast %10 : vector<2x1x32xf32> to vector<2x32x32xf32>
    %13 = vector.broadcast %11 : vector<1x32x32xf32> to vector<2x32x32xf32>
    %14 = arith.mulf %12, %13 : vector<2x32x32xf32>
    %cst_6 = arith.constant dense<0.000000e+00> : vector<2x32xf32>
    %15 = vector.multi_reduction <add>, %14, %cst_6 [2] : vector<2x32x32xf32> to vector<2x32xf32>
    %16 = vector.shape_cast %9 : vector<2x32xf32> to vector<2x1x32xf32>
    %17 = vector.shape_cast %15 : vector<2x32xf32> to vector<2x1x32xf32>
    %c0_7 = arith.constant 0 : index
    %c0_8 = arith.constant 0 : index
    %c0_9 = arith.constant 0 : index
    %18 = vector.load %arg4[%c0_7, %c0_8, %c0_9] : memref<2x8x32xf32, #tpu.memory_space<vmem>>, vector<2x8x32xf32>
    %19 = vector.broadcast %16 : vector<2x1x32xf32> to vector<2x8x32xf32>
    %20 = arith.mulf %18, %19 : vector<2x8x32xf32>
    %cst_10 = arith.constant dense<0.000000e+00> : vector<2x8xf32>
    %21 = vector.multi_reduction <add>, %20, %cst_10 [2] : vector<2x8x32xf32> to vector<2x8xf32>
    %22 = vector.broadcast %3 : f32 to vector<2x8xf32>
    %23 = arith.addf %21, %22 : vector<2x8xf32>
    %c0_11 = arith.constant 0 : index
    %c0_12 = arith.constant 0 : index
    %c0_13 = arith.constant 0 : index
    %24 = vector.load %arg9[%c0_11, %c0_12, %c0_13] : memref<2x4x8xf32, #tpu.memory_space<vmem>>, vector<2x1x8xf32>
    %25 = vector.shape_cast %24 : vector<2x1x8xf32> to vector<2x8xf32>
    %26 = vector.shape_cast %23 : vector<2x8xf32> to vector<2x1x8xf32>
    tpu.vector_store %arg9[%c0_11, %c0_12, %c0_13], %26 {strides = array<i32>} : memref<2x4x8xf32, #tpu.memory_space<vmem>>, vector<2x1x8xf32>,
    %c0_14 = arith.constant 0 : index
    %c0_15 = arith.constant 0 : index
    %c0_16 = arith.constant 0 : index
    %27 = vector.load %arg3[%c0_14, %c0_15, %c0_16] : memref<2x8x32xf32, #tpu.memory_space<vmem>>, vector<2x8x32xf32>
    %28 = vector.broadcast %17 : vector<2x1x32xf32> to vector<2x8x32xf32>
    %29 = arith.mulf %27, %28 : vector<2x8x32xf32>
    %cst_17 = arith.constant dense<0.000000e+00> : vector<2x8xf32>
    %30 = vector.multi_reduction <add>, %29, %cst_17 [2] : vector<2x8x32xf32> to vector<2x8xf32>
    %31 = vector.broadcast %3 : f32 to vector<2x8xf32>
    %32 = arith.addf %30, %31 : vector<2x8xf32>
    %c0_18 = arith.constant 0 : index
    %c1 = arith.constant 1 : index
    %c0_19 = arith.constant 0 : index
    %33 = vector.load %arg9[%c0_18, %c1, %c0_19] : memref<2x4x8xf32, #tpu.memory_space<vmem>>, vector<2x1x8xf32>
    %34 = vector.shape_cast %33 : vector<2x1x8xf32> to vector<2x8xf32>
    %35 = vector.shape_cast %32 : vector<2x8xf32> to vector<2x1x8xf32>
    tpu.vector_store %arg9[%c0_18, %c1, %c0_19], %35 {strides = array<i32>} : memref<2x4x8xf32, #tpu.memory_space<vmem>>, vector<2x1x8xf32>,
    %c0_20 = arith.constant 0 : index
    %c0_21 = arith.constant 0 : index
    %c0_22 = arith.constant 0 : index
    %36 = vector.load %arg6[%c0_20, %c0_21, %c0_22] : memref<2x8x32xf32, #tpu.memory_space<vmem>>, vector<2x8x32xf32>
    %37 = vector.broadcast %16 : vector<2x1x32xf32> to vector<2x8x32xf32>
    %38 = arith.mulf %36, %37 : vector<2x8x32xf32>
    %cst_23 = arith.constant dense<0.000000e+00> : vector<2x8xf32>
    %39 = vector.multi_reduction <add>, %38, %cst_23 [2] : vector<2x8x32xf32> to vector<2x8xf32>
    %40 = vector.broadcast %3 : f32 to vector<2x8xf32>
    %41 = arith.addf %39, %40 : vector<2x8xf32>
    %c0_24 = arith.constant 0 : index
    %c2 = arith.constant 2 : index
    %c0_25 = arith.constant 0 : index
    %42 = vector.load %arg9[%c0_24, %c2, %c0_25] : memref<2x4x8xf32, #tpu.memory_space<vmem>>, vector<2x1x8xf32>
    %43 = vector.shape_cast %42 : vector<2x1x8xf32> to vector<2x8xf32>
    %44 = vector.shape_cast %41 : vector<2x8xf32> to vector<2x1x8xf32>
    tpu.vector_store %arg9[%c0_24, %c2, %c0_25], %44 {strides = array<i32>} : memref<2x4x8xf32, #tpu.memory_space<vmem>>, vector<2x1x8xf32>,
    %c0_26 = arith.constant 0 : index
    %c0_27 = arith.constant 0 : index
    %c0_28 = arith.constant 0 : index
    %45 = vector.load %arg5[%c0_26, %c0_27, %c0_28] : memref<2x8x32xf32, #tpu.memory_space<vmem>>, vector<2x8x32xf32>
    %46 = vector.broadcast %17 : vector<2x1x32xf32> to vector<2x8x32xf32>
    %47 = arith.mulf %45, %46 : vector<2x8x32xf32>
    %cst_29 = arith.constant dense<0.000000e+00> : vector<2x8xf32>
    %48 = vector.multi_reduction <add>, %47, %cst_29 [2] : vector<2x8x32xf32> to vector<2x8xf32>
    %49 = vector.broadcast %3 : f32 to vector<2x8xf32>
    %50 = arith.addf %48, %49 : vector<2x8xf32>
    %c0_30 = arith.constant 0 : index
    %c3 = arith.constant 3 : index
    %c0_31 = arith.constant 0 : index
    %51 = vector.load %arg9[%c0_30, %c3, %c0_31] : memref<2x4x8xf32, #tpu.memory_space<vmem>>, vector<2x1x8xf32>
    %52 = vector.shape_cast %51 : vector<2x1x8xf32> to vector<2x8xf32>
    %53 = vector.shape_cast %50 : vector<2x8xf32> to vector<2x1x8xf32>
    tpu.vector_store %arg9[%c0_30, %c3, %c0_31], %53 {strides = array<i32>} : memref<2x4x8xf32, #tpu.memory_space<vmem>>, vector<2x1x8xf32>,
    return
  }
  func.func @transform_0(%arg0: i32) -> (i32, i32) {
    %c0_i32 = arith.constant 0 : i32
    %c0_i32_0 = arith.constant 0 : i32
    return %arg0, %c0_i32 : i32, i32
  }
  func.func @transform_1(%arg0: i32) -> (i32, i32) {
    %c0_i32 = arith.constant 0 : i32
    %c0_i32_0 = arith.constant 0 : i32
    return %arg0, %c0_i32 : i32, i32
  }
  func.func @transform_2(%arg0: i32) -> (i32, i32, i32) {
    %c0_i32 = arith.constant 0 : i32
    %c0_i32_0 = arith.constant 0 : i32
    %c0_i32_1 = arith.constant 0 : i32
    return %arg0, %c0_i32, %c0_i32_0 : i32, i32, i32
  }
  func.func @transform_3(%arg0: i32) -> (i32, i32, i32) {
    %c0_i32 = arith.constant 0 : i32
    %c0_i32_0 = arith.constant 0 : i32
    %c0_i32_1 = arith.constant 0 : i32
    return %arg0, %c0_i32, %c0_i32_0 : i32, i32, i32
  }
  func.func @transform_4(%arg0: i32) -> (i32, i32, i32) {
    %c0_i32 = arith.constant 0 : i32
    %c0_i32_0 = arith.constant 0 : i32
    %c0_i32_1 = arith.constant 0 : i32
    return %arg0, %c0_i32, %c0_i32_0 : i32, i32, i32
  }
  func.func @transform_5(%arg0: i32) -> (i32, i32, i32) {
    %c0_i32 = arith.constant 0 : i32
    %c0_i32_0 = arith.constant 0 : i32
    %c0_i32_1 = arith.constant 0 : i32
    return %arg0, %c0_i32, %c0_i32_0 : i32, i32, i32
  }
  func.func @transform_6(%arg0: i32) -> (i32, i32) {
    %c0_i32 = arith.constant 0 : i32
    %c0_i32_0 = arith.constant 0 : i32
    %c0_i32_1 = arith.constant 0 : i32
    return %c0_i32, %c0_i32_0 : i32, i32
  }
  func.func @transform_7(%arg0: i32) -> i32 {
    %c0_i32 = arith.constant 0 : i32
    %c0_i32_0 = arith.constant 0 : i32
    return %c0_i32 : i32
  }
  func.func @transform_8(%arg0: i32) -> (i32, i32, i32) {
    %c0_i32 = arith.constant 0 : i32
    %c0_i32_0 = arith.constant 0 : i32
    %c0_i32_1 = arith.constant 0 : i32
    return %arg0, %c0_i32, %c0_i32_0 : i32, i32, i32
  }
}

</mosaic_0001>

<bundles_post_ra>
// kernel: tpu_custom_call.1
= control target key start
LH: loop header
LB: loop body
LE: loop exit
PB: predicated region body
PF: predicated region fallthrough
CT: control target
= control target key end

     0   :  { %14 = vsyncpa [#allocation4], 0  ;;  %s850_s0 = inlined_call_operand.vmem [shape: f32[2,32], index: 0, kind: input, shape index: {}]   ;;  %s851_s1 = inlined_call_operand.hbm [shape: f32[2,32], index: 1, kind: input, shape index: {}]   ;;  %s852_s2 = inlined_call_operand.hbm [shape: f32[2,8,32], index: 2, kind: input, shape index: {}]   ;;  %s853_s3 = inlined_call_operand.hbm [shape: f32[2,8,32], index: 3, kind: input, shape index: {}]   ;;  %s854_s4 = inlined_call_operand.hbm [shape: f32[2,8,32], index: 4, kind: input, shape index: {}]   ;;  %s855_s5 = inlined_call_operand.hbm [shape: f32[2,8,32], index: 5, kind: input, shape index: {}]   ;;  %s856_s6 = inlined_call_operand.hbm [shape: f32[32,32], index: 6, kind: input, shape index: {}]   ;;  %s857_s7 = inlined_call_operand.<no memory space> [shape: f32[1], index: 7, kind: input, shape index: {}]   ;;  %s858_s8 = inlined_call_operand.hbm [shape: f32[2,4,8], index: 8, kind: output, shape index: {}]  }
   0x1   :  { %15 = vsyncpa [#allocation7], 0 }
   0x2   :  { %16 = vsyncpa [#allocation10], 0 }
   0x3   :  { %17 = vsyncpa [#allocation13], 0 }
   0x4   :  { %18 = vsyncpa [#allocation5], 0  ;;  %s673_s27 = smov [#allocation6]  }
   0x5   :  { %s36_s28 = sshll.u32 %s673_s27, 4  ;;  %s37_s28 = int_to_ptr.vmem [resolvable:$true] %s36_s28 }
   0x6   :  { %s531_s29 = scalar_lea.vmem %s37_s28, 256  ;;  %p536_p1 = scmp.lt.s32.totalorder %s37_s28, %s37_s28 }
   0x7   :  { %p532_p0 = scmp.ne.s32.totalorder %s37_s28, %s531_s29  ;;  %p537_p2 = scmp.lt.s32.totalorder %s531_s29, %s531_s29 }
   0x9   :  { %p538_p3 = por %p537_p2, %p536_p1 }
   0xb   :  { %p539_p4 = pnand %p538_p3, %p532_p0 }
   0xd   :  { %542 = shalt.err (!%p539_p4)
}
   0xe   :  { %s674_s30 = smov 128   ;;  %s675_s9 = smov 8  }
   0xf   :  { %42 = dma.hbm_to_vmem [thread:$0]  %s852_s2, 256, %s37_s28, [#allocation7], %s674_s30, %s674_s30, %s675_s9  }
  0x10   :  { %s676_s12 = smov [#allocation9]   ;;  %s677_s14 = smov [#allocation3]  }
  0x11   :  { %s60_s13 = sshll.u32 %s676_s12, 4  ;;  %s27_s15 = sshll.u32 %s677_s14, 4  ;;  %s61_s13 = int_to_ptr.vmem [resolvable:$true] %s60_s13  ;;  %s28_s15 = int_to_ptr.vmem [resolvable:$true] %s27_s15 }
  0x12   :  { %s551_s16 = scalar_lea.vmem %s61_s13, 256  ;;  %p556_p6 = scmp.lt.s32.totalorder %s61_s13, %s61_s13 }
  0x13   :  { %p552_p5 = scmp.ne.s32.totalorder %s61_s13, %s551_s16  ;;  %p557_p7 = scmp.lt.s32.totalorder %s551_s16, %s551_s16 }
  0x15   :  { %p558_p8 = por %p557_p7, %p556_p6 }
  0x17   :  { %p559_p9 = pnand %p558_p8, %p552_p5 }
  0x19   :  { %562 = shalt.err (!%p559_p9)
}
  0x1a   :  { %66 = dma.hbm_to_vmem [thread:$0]  %s854_s4, 256, %s61_s13, [#allocation10], %s674_s30, %s674_s30, %s675_s9  }
  0x1b   :  { %s571_s2 = scalar_lea.vmem %s28_s15, 32  ;;  %p576_p11 = scmp.lt.s32.totalorder %s28_s15, %s28_s15 }
  0x1c   :  { %p572_p10 = scmp.ne.s32.totalorder %s28_s15, %s571_s2  ;;  %p577_p12 = scmp.lt.s32.totalorder %s571_s2, %s571_s2 }
  0x1e   :  { %p578_p13 = por %p577_p12, %p576_p11 }
  0x20   :  { %p579_p0 = pnand %p578_p13, %p572_p10 }
  0x22   :  { %582 = shalt.err (!%p579_p0)
}
  0x23   :  { %30 = dma.hbm_to_vmem [thread:$0]  %s851_s1, 32, %s28_s15, [#allocation4]  }
  0x24   :  { %s678_s21 = smov [#allocation8]   ;;  %s679_s23 = smov [#allocation11]  }
  0x25   :  { %s48_s22 = sshll.u32 %s678_s21, 4  ;;  %s72_s24 = sshll.u32 %s679_s23, 4  ;;  %s49_s22 = int_to_ptr.vmem [resolvable:$true] %s48_s22  ;;  %s73_s24 = int_to_ptr.vmem [resolvable:$true] %s72_s24 }
  0x26   :  { %s591_s25 = scalar_lea.vmem %s49_s22, 256  ;;  %p596_p2 = scmp.lt.s32.totalorder %s49_s22, %s49_s22 }
  0x27   :  { %p592_p1 = scmp.ne.s32.totalorder %s49_s22, %s591_s25  ;;  %p597_p3 = scmp.lt.s32.totalorder %s591_s25, %s591_s25 }
  0x29   :  { %p598_p4 = por %p597_p3, %p596_p2 }
  0x2b   :  { %p599_p5 = pnand %p598_p4, %p592_p1 }
  0x2d   :  { %602 = shalt.err (!%p599_p5)
}
  0x2e   :  { %54 = dma.hbm_to_vmem [thread:$0]  %s853_s3, 256, %s49_s22, [#allocation7], %s674_s30, %s674_s30, %s675_s9  }
  0x2f   :  { %s611_s1 = scalar_lea.vmem %s73_s24, 256  ;;  %p616_p7 = scmp.lt.s32.totalorder %s73_s24, %s73_s24 }
  0x30   :  { %p612_p6 = scmp.ne.s32.totalorder %s73_s24, %s611_s1  ;;  %p617_p8 = scmp.lt.s32.totalorder %s611_s1, %s611_s1 }
  0x32   :  { %p618_p9 = por %p617_p8, %p616_p7 }
  0x34   :  { %p619_p10 = pnand %p618_p9, %p612_p6 }
  0x36   :  { %622 = shalt.err (!%p619_p10)
}
  0x37   :  { %78 = dma.hbm_to_vmem [thread:$0]  %s855_s5, 256, %s73_s24, [#allocation10], %s674_s30, %s674_s30, %s675_s9  }
  0x38   :  { %s680_s29 = smov [#allocation12]  }
  0x39   :  { %s84_s10 = sshll.u32 %s680_s29, 4  ;;  %s85_s10 = int_to_ptr.vmem [resolvable:$true] %s84_s10 }
  0x3a   :  { %s631_s11 = scalar_lea.vmem %s85_s10, 512  ;;  %p636_p12 = scmp.lt.s32.totalorder %s85_s10, %s85_s10 }
  0x3b   :  { %p632_p11 = scmp.ne.s32.totalorder %s85_s10, %s631_s11  ;;  %p637_p13 = scmp.lt.s32.totalorder %s631_s11, %s631_s11 }
  0x3d   :  { %p638_p0 = por %p637_p13, %p636_p12 }
  0x3f   :  { %p639_p1 = pnand %p638_p0, %p632_p11 }
  0x41   :  { %642 = shalt.err (!%p639_p1)
}
  0x42   :  { %90 = dma.hbm_to_vmem [thread:$0]  %s856_s6, 512, %s85_s10, [#allocation13], %s674_s30, %s674_s30, %s675_s9  }
  0x43   :  { %663 = dma.done.wait [#allocation4], 32  }
  0x44   :  { %664 = vsyncadd [#allocation4], 4294967264 }
  0x45   :  { %665 = dma.done.wait [#allocation7], 512  }
  0x46   :  { %666 = vsyncadd [#allocation7], 4294966784 }
  0x47   :  { %667 = dma.done.wait [#allocation10], 512  }
  0x48   :  { %668 = vsyncadd [#allocation10], 4294966784 }
  0x49   :  { %669 = dma.done.wait [#allocation13], 512  }
  0x4a   :  { %670 = vsyncadd [#allocation13], 4294966784  ;;  %v130_v0 = vlaneseq  ;;  %v681_v1 = vmov 1966171168   ;;  %v114_v15 = vld [vmem:[#allocation12 + $0x8] sm:$0xff]  ;;  %v113_v19 = vld [vmem:[#allocation12] sm:$0xff] }
  0x4b   :  { %v128_v2 = vunpack.c.l.s4 %v681_v1  ;;  %v510_v11 = vld.sshfl [vmem:[#allocation3] sm:$0x11 pattern:$0x75316420]  ;;  %vm159_vm0 = vcmask 261120   ;;  %v115_v35 = vld [vmem:[#allocation12 + $0x10] sm:$0xff] }
  0x4c   :  { %v763_v3 = vshrl.u32 %v130_v0, 7  ;;  %v765_v4 = vand.u32 127, %v130_v0  ;;  %v192_v13 = vcombine.high %v510_v11, %v510_v11  ;;  %v509_v14 = vld.sshfl [vmem:[%s850_s0] sm:$0x11 pattern:$0x75316420] }
  0x4d   :  { %v129_v5 = vunpack.c.0.s8 %v128_v2  ;;  %v126_v17 = vcombine.high %v509_v14, %v509_v14  ;;  %v116_v48 = vld [vmem:[#allocation12 + $0x18] sm:$0xff]  ;;  %vm270_vm1 = vcmask 130112   ;;  %vm277_vm2 = vcmask 195712  }
  0x4e   :  { %v769_v6 = vsub.s32 %v765_v4, %v763_v3  ;;  %v265_v7 = vadd.s32 4294967288, %v765_v4  ;;  %v143_v9 = vsub.s32 0, %v763_v3  ;;  %v272_v53 = vadd.s32 4294967280, %v765_v4 }
  0x4f   :  { %v132_v8 = vsub.s32 %v129_v5, %v763_v3  ;;  %v279_v61 = vadd.s32 4294967272, %v765_v4  ;;  %vm284_vm3 = vcmask 261312   ;;  %vm348_vm4 = vcmask 57344  }
  0x50   :  { %v775_v10 = vsub.s32 %v265_v7, %v763_v3  ;;  %v275_v56 = vsub.s32 %v272_v53, %v763_v3 }
  0x51   :  { %v199_v12 = vrot.slane %v510_v11, %v132_v8  ;;  %v133_v16 = vrot.slane %v509_v14, %v132_v8  ;;  %v140_v21 = vrot.slane %v126_v17, %v132_v8  ;;  %v206_v23 = vrot.slane %v192_v13, %v132_v8 }
  0x52   :  { %v282_v62 = vsub.s32 %v279_v61, %v763_v3  ;;  %v463_v61 = vld [vmem:[#allocation9] sm:$0xff] }
  0x53   :  { %v210_v18 = vrot.slane %v199_v12, %v143_v9  ;;  %v144_v20 = vrot.slane %v133_v16, %v143_v9  ;;  %v148_v26 = vrot.slane %v140_v21, %v143_v9  ;;  %v214_v31 = vrot.slane %v206_v23, %v143_v9 }
  0x55   :  { %v218_v22 = vmul.f32 %v210_v18, %v114_v15  ;;  %v151_v24 = vmul.f32 %v144_v20, %v113_v19  ;;  %v152_v25 = vmul.f32 %v144_v20, %v114_v15  ;;  %v155_v29 = vmul.f32 %v148_v26, %v113_v19 }
  0x56   :  { %v156_v30 = vmul.f32 %v148_v26, %v114_v15  ;;  %v217_v34 = vmul.f32 %v210_v18, %v113_v19  ;;  %v222_v37 = vmul.f32 %v214_v31, %v114_v15  ;;  %v153_v39 = vmul.f32 %v144_v20, %v115_v35 }
  0x57   :  { %v228_v27 = vsel %vm159_vm0, %v218_v22, 0.0  ;;  %v160_v28 = vsel %vm159_vm0, %v151_v24, 0.0  ;;  %v163_v32 = vsel %vm159_vm0, %v152_v25, 0.0  ;;  %v172_v33 = vsel %vm159_vm0, %v155_v29, 0.0 }
  0x58   :  { %229 = vadd.xlane.f32.xlu1 %v228_v27  ;;  %161 = vadd.xlane.f32.xlu0 %v160_v28  ;;  %v175_v36 = vsel %vm159_vm0, %v156_v30, 0.0  ;;  %v225_v38 = vsel %vm159_vm0, %v217_v34, 0.0  ;;  %v240_v40 = vsel %vm159_vm0, %v222_v37, 0.0  ;;  %v157_v41 = vmul.f32 %v148_v26, %v115_v35 }
  0x59   :  { %v166_v42 = vsel %vm159_vm0, %v153_v39, 0.0  ;;  %v221_v43 = vmul.f32 %v214_v31, %v113_v19  ;;  %v223_v45 = vmul.f32 %v214_v31, %v115_v35  ;;  %v219_v47 = vmul.f32 %v210_v18, %v115_v35 }
  0x5a   :  { %v178_v44 = vsel %vm159_vm0, %v157_v41, 0.0  ;;  %v158_v50 = vmul.f32 %v148_v26, %v116_v48  ;;  %v154_v52 = vmul.f32 %v144_v20, %v116_v48  ;;  %v224_v55 = vmul.f32 %v214_v31, %v116_v48 }
  0x5b   :  { %v237_v46 = vsel %vm159_vm0, %v221_v43, 0.0  ;;  %v243_v49 = vsel %vm159_vm0, %v223_v45, 0.0  ;;  %v231_v51 = vsel %vm159_vm0, %v219_v47, 0.0  ;;  %v220_v58 = vmul.f32 %v210_v18, %v116_v48  ;;  %v352_v45 = vld [vmem:[#allocation6 + $0x8] sm:$0xff]  ;;  %v351_v48 = vld [vmem:[#allocation6] sm:$0xff] }
  0x5c   :  { %173 = vadd.xlane.f32.xlu1 %v172_v33  ;;  %164 = vadd.xlane.f32.xlu0 %v163_v32  ;;  %v181_v54 = vsel %vm159_vm0, %v158_v50, 0.0  ;;  %v169_v57 = vsel %vm159_vm0, %v154_v52, 0.0  ;;  %v246_v59 = vsel %vm159_vm0, %v224_v55, 0.0 }
  0x5d   :  { %v234_v60 = vsel %vm159_vm0, %v220_v58, 0.0 }
  0x60   :  { %176 = vadd.xlane.f32.xlu1 %v175_v36  ;;  %226 = vadd.xlane.f32.xlu0 %v225_v38  ;;  %v250_v36 = vld [vmem:[#allocation8 + $0x8] sm:$0xff]  ;;  %v249_v38 = vld [vmem:[#allocation8] sm:$0xff] }
  0x64   :  { %241 = vadd.xlane.f32.xlu1 %v240_v40  ;;  %167 = vadd.xlane.f32.xlu0 %v166_v42 }
  0x68   :  { %179 = vadd.xlane.f32.xlu1 %v178_v44  ;;  %238 = vadd.xlane.f32.xlu0 %v237_v46 }
  0x6c   :  { %244 = vadd.xlane.f32.xlu1 %v243_v49  ;;  %232 = vadd.xlane.f32.xlu0 %v231_v51  ;;  %v438_v51 = vld [vmem:[#allocation11 + $0x8] sm:$0xff] }
  0x70   :  { %182 = vadd.xlane.f32.xlu1 %v181_v54  ;;  %170 = vadd.xlane.f32.xlu0 %v169_v57  ;;  %v437_v54 = vld [vmem:[#allocation11] sm:$0xff] }
  0x74   :  { %247 = vadd.xlane.f32.xlu1 %v246_v59  ;;  %235 = vadd.xlane.f32.xlu0 %v234_v60  ;;  %v464_v60 = vld [vmem:[#allocation9 + $0x8] sm:$0xff] }
  0xe1   :  { %v230_v63 = vpop.xlane.xlu1 %229  ;;  %v162_v0 = vpop.xlane.xlu0 %161 }
  0xe2   :  { %v264_v11 = vrot.slane %v162_v0, %v769_v6  ;;  %v368_v25 = vrot.slane %v230_v63, %v775_v10 }
  0xe5   :  { %v174_v1 = vpop.xlane.xlu1 %173  ;;  %v165_v2 = vpop.xlane.xlu0 %164 }
  0xe6   :  { %v269_v8 = vrot.slane %v165_v2, %v775_v10  ;;  %v289_v3 = vrot.slane %v174_v1, %v769_v6 }
  0xe8   :  { %v271_v4 = vsel %vm270_vm1, %v269_v8, %v264_v11 }
  0xe9   :  { %v177_v5 = vpop.xlane.xlu1 %176  ;;  %v227_v7 = vpop.xlane.xlu0 %226 }
  0xea   :  { %v293_v13 = vrot.slane %v177_v5, %v775_v10  ;;  %v364_v21 = vrot.slane %v227_v7, %v769_v6  ;;  %v333_v7 = vstv %s857_s7  ;;  %s682_s7 = smov [#allocation14]  }
  0xeb   :  { %s494_s9 = sshll.u32 %s682_s7, 4  ;;  %s495_s9 = int_to_ptr.vmem [resolvable:$true] %s494_s9 }
  0xec   :  { %v294_v19 = vsel %vm270_vm1, %v293_v13, %v289_v3  ;;  %v369_v30 = vsel %vm270_vm1, %v368_v25, %v364_v21  ;;  %s643_s13 = scalar_lea.vmem %s495_s9, 128  ;;  %p648_p3 = scmp.lt.s32.totalorder %s495_s9, %s495_s9 }
  0xed   :  { %v242_v9 = vpop.xlane.xlu1 %241  ;;  %v168_v12 = vpop.xlane.xlu0 %167  ;;  %p644_p2 = scmp.ne.s32.totalorder %s495_s9, %s643_s13  ;;  %p649_p4 = scmp.lt.s32.totalorder %s643_s13, %s643_s13 }
  0xee   :  { %v276_v14 = vrot.slane %v168_v12, %v275_v56  ;;  %v387_v23 = vrot.slane %v242_v9, %v775_v10 }
  0xef   :  { %p650_p5 = por %p649_p4, %p648_p3 }
  0xf0   :  { %v278_v15 = vsel %vm277_vm2, %v276_v14, %v271_v4 }
  0xf1   :  { %v180_v16 = vpop.xlane.xlu1 %179  ;;  %v239_v17 = vpop.xlane.xlu0 %238  ;;  %p651_p6 = pnand %p650_p5, %p644_p2 }
  0xf2   :  { %v298_v18 = vrot.slane %v180_v16, %v275_v56  ;;  %v383_v20 = vrot.slane %v239_v17, %v769_v6 }
  0xf4   :  { %v299_v22 = vsel %vm277_vm2, %v298_v18, %v294_v19  ;;  %v388_v28 = vsel %vm270_vm1, %v387_v23, %v383_v20 }
  0xf5   :  { %v245_v24 = vpop.xlane.xlu1 %244  ;;  %v233_v26 = vpop.xlane.xlu0 %232 }
  0xf6   :  { %v392_v27 = vrot.slane %v245_v24, %v275_v56  ;;  %v373_v29 = vrot.slane %v233_v26, %v275_v56 }
  0xf8   :  { %v393_v31 = vsel %vm277_vm2, %v392_v27, %v388_v28  ;;  %v374_v32 = vsel %vm277_vm2, %v373_v29, %v369_v30 }
  0xf9   :  { %v183_v33 = vpop.xlane.xlu1 %182  ;;  %v171_v34 = vpop.xlane.xlu0 %170 }
  0xfa   :  { %v303_v35 = vrot.slane %v183_v33, %v282_v62  ;;  %v283_v37 = vrot.slane %v171_v34, %v282_v62 }
  0xfc   :  { %v304_v10 = vsel %vm284_vm3, %v303_v35, %v299_v22  ;;  %v285_v40 = vsel %vm284_vm3, %v283_v37, %v278_v15 }
  0xfd   :  { %v248_v39 = vpop.xlane.xlu1 %247  ;;  %v326_v41 = vmul.f32 %v304_v10, %v250_v36  ;;  %v236_v42 = vpop.xlane.xlu0 %235  ;;  %v325_v44 = vmul.f32 %v285_v40, %v249_v38  ;;  %v440_v57 = vmul.f32 %v438_v51, %v304_v10  ;;  %v439_v59 = vmul.f32 %v437_v54, %v285_v40 }
  0xfe   :  { %v397_v43 = vrot.slane %v248_v39, %v282_v62  ;;  %v378_v46 = vrot.slane %v236_v42, %v282_v62 }
  0xff   :  { %v330_v47 = vsel %vm159_vm0, %v326_v41, 0.0  ;;  %v327_v49 = vsel %vm159_vm0, %v325_v44, 0.0  ;;  %v444_v62 = vsel %vm159_vm0, %v440_v57, 0.0  ;;  %v441_v0 = vsel %vm159_vm0, %v439_v59, 0.0 }
 0x100   :  { %331 = vadd.xlane.f32.xlu1 %v330_v47  ;;  %v398_v50 = vsel %vm284_vm3, %v397_v43, %v393_v31  ;;  %328 = vadd.xlane.f32.xlu0 %v327_v49  ;;  %v379_v52 = vsel %vm284_vm3, %v378_v46, %v374_v32 }
 0x101   :  { %v414_v53 = vmul.f32 %v398_v50, %v352_v45  ;;  %v413_v55 = vmul.f32 %v379_v52, %v351_v48  ;;  %v466_v63 = vmul.f32 %v464_v60, %v398_v50  ;;  %v465_v1 = vmul.f32 %v463_v61, %v379_v52 }
 0x103   :  { %v418_v56 = vsel %vm159_vm0, %v414_v53, 0.0  ;;  %v415_v58 = vsel %vm159_vm0, %v413_v55, 0.0  ;;  %v470_v2 = vsel %vm159_vm0, %v466_v63, 0.0  ;;  %v467_v5 = vsel %vm159_vm0, %v465_v1, 0.0 }
 0x104   :  { %419 = vadd.xlane.f32.xlu1 %v418_v56  ;;  %416 = vadd.xlane.f32.xlu0 %v415_v58 }
 0x108   :  { %445 = vadd.xlane.f32.xlu1 %v444_v62  ;;  %442 = vadd.xlane.f32.xlu0 %v441_v0 }
 0x10c   :  { %471 = vadd.xlane.f32.xlu1 %v470_v2  ;;  %468 = vadd.xlane.f32.xlu0 %v467_v5 }
 0x189   :  { %v332_v8 = vpop.xlane.xlu1 %331  ;;  %v329_v9 = vpop.xlane.xlu0 %328 }
 0x18a   :  { %v335_v11 = vadd.f32 %v333_v7, %v332_v8  ;;  %v334_v12 = vadd.f32 %v333_v7, %v329_v9 }
 0x18c   :  { %v345_v13 = vrot.slane %v335_v11, %v769_v6  ;;  %v341_v14 = vrot.slane %v334_v12, %v769_v6 }
 0x18d   :  { %v420_v4 = vpop.xlane.xlu1 %419  ;;  %v417_v3 = vpop.xlane.xlu0 %416 }
 0x18e   :  { %350 = vst.msk [vmem:[#allocation14 + $0x4] sm:$0x1] %vm348_vm4, %v345_v13  ;;  %v422_v15 = vadd.f32 %v420_v4, %v333_v7  ;;  %349 = vst.msk [vmem:[#allocation14] sm:$0x1] %vm348_vm4, %v341_v14  ;;  %v421_v16 = vadd.f32 %v417_v3, %v333_v7 }
 0x190   :  { %v432_v17 = vrot.slane %v422_v15, %v769_v6  ;;  %v428_v18 = vrot.slane %v421_v16, %v769_v6 }
 0x191   :  { %v446_v19 = vpop.xlane.xlu1 %445  ;;  %v443_v20 = vpop.xlane.xlu0 %442 }
 0x192   :  { %436 = vst.msk [vmem:[#allocation14 + $0x5] sm:$0x1] %vm348_vm4, %v432_v17  ;;  %v448_v21 = vadd.f32 %v446_v19, %v333_v7  ;;  %435 = vst.msk [vmem:[#allocation14 + $0x1] sm:$0x1] %vm348_vm4, %v428_v18  ;;  %v447_v22 = vadd.f32 %v443_v20, %v333_v7 }
 0x194   :  { %v458_v23 = vrot.slane %v448_v21, %v769_v6  ;;  %v454_v24 = vrot.slane %v447_v22, %v769_v6 }
 0x195   :  { %v472_v25 = vpop.xlane.xlu1 %471  ;;  %v469_v26 = vpop.xlane.xlu0 %468 }
 0x196   :  { %462 = vst.msk [vmem:[#allocation14 + $0x6] sm:$0x1] %vm348_vm4, %v458_v23  ;;  %v474_v27 = vadd.f32 %v472_v25, %v333_v7  ;;  %461 = vst.msk [vmem:[#allocation14 + $0x2] sm:$0x1] %vm348_vm4, %v454_v24  ;;  %v473_v28 = vadd.f32 %v469_v26, %v333_v7 }
 0x198   :  { %v484_v29 = vrot.slane %v474_v27, %v769_v6  ;;  %v480_v30 = vrot.slane %v473_v28, %v769_v6 }
 0x19a   :  { %488 = vst.msk [vmem:[#allocation14 + $0x7] sm:$0x1] %vm348_vm4, %v484_v29  ;;  %487 = vst.msk [vmem:[#allocation14 + $0x3] sm:$0x1] %vm348_vm4, %v480_v30 }
 0x19b   :  { %654 = shalt.err (!%p651_p6)
}
 0x19c   :  { %s683_s14 = smov 64   ;;  %s684_s15 = smov 4  }
 0x19d   :  { %500 = dma.vmem_to_hbm [thread:$0]  %s495_s9, 128, %s858_s8, [#allocation5], %s683_s14, %s683_s14, %s684_s15  }
 0x19e   :  { %671 = dma.done.wait [#allocation5], 128  }
 0x19f   :  { %672 = vsyncadd [#allocation5], 4294967168 }
 0x1a0   :  { %504 = vsyncpa [#allocation4], 1 }
 0x1a1   :  { %505 = vsyncpa [#allocation7], 1 }
 0x1a2   :  { %506 = vsyncpa [#allocation10], 1 }
 0x1a3   :  { %507 = vsyncpa [#allocation13], 1 }
 0x1a4   :  { %508 = vsyncpa [#allocation5], 1 }

</bundles_post_ra>
